<compile_context>
chip_gen: v6e
topology: v6e:2x2x1
jax: 0.10.0
libtpu: 0.0.40
codegen_flags: <defaults>
</compile_context>

<pallas_src>
import functools

import jax
import jax.numpy as jnp
from jax.experimental import pallas as pl
from jax.experimental.pallas import tpu as pltpu


def _normalize_kernel(x_ref, o_ref, *, power, upcast):
    # One tile: (tm, D). Reduce over the feature (lane) axis.
    if upcast:
        x = x_ref[...].astype(jnp.float32)
    else:
        x = x_ref[...]  # native bf16/f16 VALU compute; f32 accumulation below.

    if power == 2:
        s = jnp.sum((x * x).astype(jnp.float32), axis=-1, keepdims=True)
        inv_norm = jax.lax.rsqrt(s)
    elif isinstance(power, int) and power > 0:
        # Repeated VPU multiplies (VALU slots) instead of exp/log pow (EUP).
        xp = x
        for _ in range(power - 1):
            xp = xp * x
        s = jnp.sum(xp.astype(jnp.float32), axis=-1, keepdims=True)
        if power == 1:
            inv_norm = pl.reciprocal(s, approx=False)
        elif power == 4:
            inv_norm = jax.lax.rsqrt(jnp.sqrt(s))
        else:
            inv_norm = jnp.power(s, -1.0 / power)
    else:
        s = jnp.sum(jnp.power(x.astype(jnp.float32), power),
                    axis=-1, keepdims=True)
        inv_norm = jnp.power(s, -1.0 / power)

    # Re-read x for the final scale (keeps the wide intermediate's live range
    # short; vld slots are plentiful in this mem-bound kernel).
    o_ref[...] = (x_ref[...] * inv_norm).astype(o_ref.dtype)


@functools.lru_cache(maxsize=None)
def _chip_params():
    """Best-effort generation detection for tile-byte / grid tuning."""
    try:
        kind = jax.devices()[0].device_kind.lower()
    except Exception:  # pragma: no cover
        kind = ""
    if "v7" in kind:
        # 2 TCs/chip, 3.2 TB/s HBM, 64 MiB VMEM per TC -> bigger tiles pay off.
        return dict(tile_bytes=4 << 20, vmem_cap=48 << 20, num_tc=2,
                    native_bf16=True)
    if "v6" in kind:
        return dict(tile_bytes=2 << 20, vmem_cap=64 << 20, num_tc=1,
                    native_bf16=True)
    if "v5" in kind and ("lite" in kind or "v5e" in kind):
        return dict(tile_bytes=2 << 20, vmem_cap=64 << 20, num_tc=1,
                    native_bf16=False)
    # Unknown / older chips: conservative defaults.
    num_tc = 2 if ("v4" in kind or "v5p" in kind) else 1
    return dict(tile_bytes=2 << 20, vmem_cap=64 << 20, num_tc=num_tc,
                native_bf16=False)


def _choose_tm(n, d, itemsize, target_tile_bytes, num_tc):
    """Row tile: sized by bytes for HBM saturation, shaped for the grid/TCs."""
    sub = 8 if itemsize >= 4 else 16          # sublane packing (f32 vs bf16/f16)
    row_bytes = max(d * itemsize, 1)

    if n < 8:
        return n                               # single full-row-dim block (legal)

    n8 = (n // 8) * 8                          # largest legal row block <= n
    # Bytes-capped tile (no hard row cap): ~target_tile_bytes per buffer.
    tm = max(sub, (target_tile_bytes // row_bytes) // sub * sub)
    tm = min(tm, n8)

    steps = pl.cdiv(n, tm)
    if num_tc >= 2:
        # Megacore (v7x/v4): even step count >= 2 so both TCs get equal halves.
        target_steps = max(2, steps + (steps % 2))
    else:
        # Single TC (v5e/v6e): never manufacture extra steps (smaller tiles fall
        # off the roofline); just allow >= 2 steps for DMA/compute overlap.
        target_steps = max(2, steps) if n >= 2 * sub else steps

    if target_steps != steps:
        tm2 = pl.cdiv(pl.cdiv(n, target_steps), sub) * sub
        tm = max(8, min(tm, tm2, n8))
    return int(tm)


def normalize(x, power=2, donate_input=False):
    """L-p normalization along axis 1 of a (batch, features) array."""
    # TODO(synk): the PyTorch module also accepts higher-rank tensors (reduce
    # over dim 1 keeping trailing dims); only rank-2 is implemented here.
    assert x.ndim == 2, "normalize() expects a 2-D (batch, features) array"
    n, d = x.shape
    itemsize = jnp.dtype(x.dtype).itemsize
    params = _chip_params()

    # Lane-dense feature axis: pad D up to a multiple of 128 with zeros, which
    # contribute 0 to sum(x**p) for p > 0, so the norm is unchanged.  For
    # non-positive p we leave D as-is (full-dim block, masked stores).
    pos_power = isinstance(power, (int, float)) and power > 0
    d_pad = int(pl.cdiv(d, 128) * 128) if pos_power else d
    x_in = x if d_pad == d else jnp.pad(x, ((0, 0), (0, d_pad - d)))

    tm = _choose_tm(n, d_pad, itemsize, params["tile_bytes"], params["num_tc"])
    grid = (pl.cdiv(n, tm),)   # ragged n: partial last block, no row padding

    # VMEM footprint: in + out tiles double-buffered, plus f32 intermediates.
    tile_bytes = tm * d_pad * itemsize
    f32_tile_bytes = tm * d_pad * 4
    vmem_need = 2 * 2 * tile_bytes + 2 * f32_tile_bytes
    vmem_limit = int(min(max(vmem_need + (4 << 20), 16 << 20),
                         params["vmem_cap"]))
    # TODO(synk): for enormous D (a single (8, D) block over the VMEM budget) a
    # second grid axis over D with a VMEM accumulator would be needed; D up to
    # a few hundred thousand floats still fits the current single-axis scheme.

    upcast = not (itemsize == 2 and params["native_bf16"])
    kernel = functools.partial(_normalize_kernel, power=power, upcast=upcast)

    out = pl.pallas_call(
        kernel,
        out_shape=jax.ShapeDtypeStruct((n, d_pad), x.dtype),
        grid_spec=pl.GridSpec(
            grid=grid,
            in_specs=[pl.BlockSpec((tm, d_pad), lambda i: (i, 0))],
            out_specs=pl.BlockSpec((tm, d_pad), lambda i: (i, 0)),
        ),
        compiler_params=pltpu.CompilerParams(
            dimension_semantics=("parallel",),
            vmem_limit_bytes=vmem_limit,
        ),
        input_output_aliases=({0: 0} if (donate_input and d_pad == d) else {}),
    )(x_in)
    return out if d_pad == d else out[:, :d]


if __name__ == "__main__":
    key = jax.random.PRNGKey(0)
    k1, k2, k3 = jax.random.split(key, 3)

    # p = 2, ragged batch (exercises the partial-last-block path: no pad copy).
    x = jax.random.normal(k1, (10, 128), dtype=jnp.float32)
    out = jax.block_until_ready(normalize(x, power=2))
    ref = x / jnp.power(jnp.sum(jnp.power(x, 2), axis=1, keepdims=True), 0.5)
    assert jnp.allclose(out, ref, atol=1e-5, rtol=1e-5), "p=2 mismatch"

    # p = 4 (integer-power repeated-multiply branch).
    out4 = jax.block_until_ready(normalize(x, power=4))
    ref4 = x / jnp.power(jnp.sum(jnp.power(x, 4), axis=1, keepdims=True), 0.25)
    assert jnp.allclose(out4, ref4, atol=1e-4, rtol=1e-4), "p=4 mismatch"

    # Feature dim not a multiple of 128 (lane-dense feature-padding path).
    xs = jax.random.normal(k2, (6, 96), dtype=jnp.float32)
    outs = jax.block_until_ready(normalize(xs, power=2))
    refs = xs / jnp.power(jnp.sum(jnp.power(xs, 2), axis=1, keepdims=True), 0.5)
    assert jnp.allclose(outs, refs, atol=1e-5, rtol=1e-5), "padded-D mismatch"

    # bf16 input (native-dtype compute with f32 accumulation on v6e/v7x).
    xb32 = jax.random.normal(k3, (10, 128), dtype=jnp.float32)
    xb = xb32.astype(jnp.bfloat16)
    outb = jax.block_until_ready(normalize(xb, power=2))
    xbf = xb.astype(jnp.float32)
    refb = xbf / jnp.power(jnp.sum(jnp.power(xbf, 2), axis=1, keepdims=True), 0.5)
    assert jnp.allclose(outb.astype(jnp.float32), refb, atol=2e-2, rtol=2e-2), \
        "bf16 mismatch"

    print("KERNEL_OK")
</pallas_src>

<mosaic_0001>
module attributes {stable_mosaic.version = 11 : i64} {
  func.func @_normalize_kernel(%arg0: i32, %arg1: memref<8x128xf32, #tpu.memory_space<vmem>>, %arg2: memref<8x128xf32, #tpu.memory_space<vmem>>) attributes {dimension_semantics = [#tpu.dimension_semantics<parallel>], iteration_bounds = array<i64: 2>, scalar_prefetch = 0 : i64, scratch_operands = 0 : i64, tpu.core_type = #tpu.core_type<tc>, window_params = [{transform_indices = @transform_0, window_bounds = array<i64: 8, 128>}, {transform_indices = @transform_1, window_bounds = array<i64: 8, 128>}]} {
    %c0 = arith.constant 0 : index
    %c0_0 = arith.constant 0 : index
    %0 = vector.load %arg1[%c0, %c0_0] : memref<8x128xf32, #tpu.memory_space<vmem>>, vector<8x128xf32>
    %1 = arith.mulf %0, %0 : vector<8x128xf32>
    %cst = arith.constant dense<0.000000e+00> : vector<8xf32>
    %2 = vector.multi_reduction <add>, %1, %cst [1] : vector<8x128xf32> to vector<8xf32>
    %3 = vector.shape_cast %2 : vector<8xf32> to vector<8x1xf32>
    %4 = math.rsqrt %3 : vector<8x1xf32>
    %c0_1 = arith.constant 0 : index
    %c0_2 = arith.constant 0 : index
    %5 = vector.load %arg1[%c0_1, %c0_2] : memref<8x128xf32, #tpu.memory_space<vmem>>, vector<8x128xf32>
    %6 = vector.broadcast %4 : vector<8x1xf32> to vector<8x128xf32>
    %7 = arith.mulf %5, %6 : vector<8x128xf32>
    %c0_3 = arith.constant 0 : index
    %c0_4 = arith.constant 0 : index
    %8 = vector.load %arg2[%c0_3, %c0_4] : memref<8x128xf32, #tpu.memory_space<vmem>>, vector<8x128xf32>
    tpu.vector_store %arg2[%c0_3, %c0_4], %7 {strides = array<i32>} : memref<8x128xf32, #tpu.memory_space<vmem>>, vector<8x128xf32>,
    return
  }
  func.func @transform_0(%arg0: i32) -> (i32, i32) {
    %c0_i32 = arith.constant 0 : i32
    %c0_i32_0 = arith.constant 0 : i32
    return %arg0, %c0_i32 : i32, i32
  }
  func.func @transform_1(%arg0: i32) -> (i32, i32) {
    %c0_i32 = arith.constant 0 : i32
    %c0_i32_0 = arith.constant 0 : i32
    return %arg0, %c0_i32 : i32, i32
  }
}

</mosaic_0001>

<bundles_post_ra>
// kernel: tpu_custom_call.1
= control target key start
LH: loop header
LB: loop body
LE: loop exit
PB: predicated region body
PF: predicated region fallthrough
CT: control target
= control target key end

     0   :  { %6 = vsyncpa [#allocation3], 0  ;;  %s530_s0 = inlined_call_operand.hbm [shape: f32[10,128], index: 0, kind: input, shape index: {}]   ;;  %s531_s1 = inlined_call_operand.hbm [shape: f32[10,128], index: 1, kind: output, shape index: {}]  }
   0x1   :  { %8 = vsyncpa [#allocation3 + $0x1], 0 }
   0x2   :  { %9 = vsyncpa [#allocation4], 0 }
   0x3   :  { %11 = vsyncpa [#allocation4 + $0x1], 0  ;;  %s389_s6 = smov 0   ;;  %s391_s7 = smov 0  }
   0x4   :  { %s393_s8 = smov 0   ;;  %s395_s9 = smov 0  }
   0x5 LB: > { %s410_s10 = sadd.s32 4294967295, %s375_s9   ;;  %s223_s11 = sadd.s32 4294967294, %s375_s9   ;;  %s375_s9 = sphi %s395_s9, %s548_s9   ;;  %s371_s8 = sphi %s393_s8, %s547_s8   ;;  %s367_s7 = sphi %s391_s7, %s546_s7   ;;  %s363_s6 = sphi %s389_s6, %s545_s6  }
   0x6   : > { %s414_s12 = sadd.s32 1, %s375_s9   ;;  %s24_s13 = sadd.s32 1, %s371_s8 }
   0x7   : > { %s21_s14 = ssub.s32 %s375_s9, %s414_s12  ;;  %p31_p0 = scmp.ne.s32.totalorder %s371_s8, %s367_s7 }
   0x8   : > { %p22_p1 = scmp.eq.s32.totalorder %s21_s14, 0  ;;  %p32_p2 = scmp.eq.s32.totalorder %s375_s9, 0 }
   0x9   : > { %p37_p3 = scmp.ne.s32.totalorder %s367_s7, %s363_s6  ;;  %p38_p4 = scmp.eq.s32.totalorder %s410_s10, 0 }
   0xa   : > { %s426_s15 = scalar_select %p22_p1, %s371_s8, %s24_s13  }
   0xb   : > { %p428_p5 = por %p32_p2, %p31_p0  ;;  %p432_p6 = por %p38_p4, %p37_p3 }
   0xc   : > { %p61_p7 = scmp.eq.s32.totalorder %s410_s10, 1  ;;  %p67_p8 = scmp.eq.s32.totalorder %s223_s11, 1 }
   0xd   : > { %s535_s17 = scalar_select %p432_p6, 1, 0 }
   0xe   : > { %p247_p10 = scmp.lt.s32.totalorder %s375_s9, 2  ;;  %p439_p11 = por %p61_p7, %p31_p0 }
   0xf   : > { %p443_p12 = por %p67_p8, %p37_p3  ;;  %s87_s20 = sand.u32 1, %s371_s8  }
  0x10   : > { %s536_s18 = scalar_select %p439_p11, 1, 0 }
  0x11   : > { %s537_s19 = scalar_select %p443_p12, 1, 0 }
  0x12   : > { %s227_s21 = sshll.u32 %s375_s9, 7  ;;  %s226_s22 = sshll.u32 %s87_s20, 3 }
  0x13   : > { %s452_s25 = scalar_lea.hbm %s530_s0, %s227_s21  ;;  %s91_s26 = scalar_lea.vmem [#allocation2], %s226_s22 }
  0x14   : > { %s98_s27 = sshll.u32 %s91_s26, 4  ;;  %p456_p13 = pnand %p247_p10, %p428_p5  ;;  %s460_s27 = int_to_ptr.vmem [resolvable:$true] %s98_s27 }
  0x15   : > { %s88_s29 = scalar_lea.sflag [#allocation3], %s87_s20  ;;  %s283_s30 = scalar_lea.hbm %s452_s25, 128 }
  0x16   : > { %p284_p2 = scmp.ne.s32.totalorder %s452_s25, %s283_s30  ;;  %p285_p3 = pneg %p456_p13 }
  0x17   : > { %s288_s4 = scalar_lea.hbm %s530_s0, 256  ;;  %p289_p5 = scmp.lt.s32.totalorder %s452_s25, %s530_s0 }
  0x18   : > { %p286_p4 = pnand %p285_p3, %p284_p2  ;;  %p290_p8 = scmp.lt.s32.totalorder %s288_s4, %s283_s30 }
  0x1a   : > { %p287_p7 = pneg %p286_p4  ;;  %p291_p10 = por %p290_p8, %p289_p5 }
  0x1c   : > { %p292_p9 = pnand %p291_p10, %p287_p7 }
  0x1e   : > { %295 = shalt.err (!%p292_p9)
}
  0x1f   : > { %s296_s13 = scalar_lea.vmem %s460_s27, 128  ;;  %s377_s14 = smov [#allocation2]  }
  0x20   : > { %p297_p0 = scmp.ne.s32.totalorder %s460_s27, %s296_s13  ;;  %s301_s16 = sshll.u32 %s377_s14, 4  ;;  %s302_s16 = int_to_ptr.vmem [resolvable:$false] %s301_s16 }
  0x21   : > { %s303_s20 = scalar_lea.vmem %s302_s16, 256  ;;  %p304_p4 = scmp.lt.s32.totalorder %s460_s27, %s302_s16 }
  0x22   : > { %p299_p1 = pnand %p297_p0, %p285_p3  ;;  %p305_p12 = scmp.lt.s32.totalorder %s303_s20, %s296_s13 }
  0x24   : > { %p300_p2 = pneg %p299_p1  ;;  %p306_p11 = por %p305_p12, %p304_p4 }
  0x26   : > { %p307_p6 = pnand %p306_p11, %p300_p2 }
  0x28   : > { %310 = shalt.err (!%p307_p6)
}
  0x29   : > { %242 = dma.hbm_to_vmem [thread:$0]  (!%p456_p13), %s452_s25, 128, %s460_s27, %s88_s29  }
  0x2a   : > { %p539_p9 = scmp.lt.s32.totalorder %s375_s9, 3  ;;  %p540_p7 = scmp.ge.s32.totalorder %s375_s9, 1 }
  0x2c   : > { %p104_p0 = pnand %p540_p7, %p539_p9 }
  0x2d   : > { %s487_s21 = sand.u32 (!%p104_p0), 1, %s367_s7   ;;  %p541_p6 = scmp.ne.s32.totalorder (!%p104_p0), %s535_s17, 0 }
  0x2e   : > { %107 = sbr.rel (%p104_p0) target bundleno = 222 (0xde), region = 24  ;;  %s229_s22 = sshll.u32 (!%p104_p0), %s487_s21, 3 }
  0x2f   : > { %s110_s23 = scalar_lea.sflag (!%p104_p0), [#allocation3], %s487_s21  ;;  %s113_s24 = scalar_lea.vmem (!%p104_p0), [#allocation2], %s229_s22 }
  0x33   : > { %354 = dma.done.wait (%p541_p6), %s110_s23, 128  }
  0x34   : > { %356 = vsyncadd (%p541_p6), %s110_s23, 4294967168  ;;  %v132_v0 = vld [vmem:[%s113_s24] sm:$0xff]  ;;  %s232_s25 = sshll.u32 %s410_s10, 7  ;;  %s131_s26 = scalar_lea.vmem [#allocation5], %s229_s22 }
  0x35   : > { %v133_v1 = vmul.f32 %v132_v0, %v132_v0  ;;  %s153_s27 = sshll.u32 %s131_s26, 4  ;;  %s151_s30 = scalar_lea.hbm %s531_s1, %s232_s25  ;;  %s154_s27 = int_to_ptr.vmem [resolvable:$true] %s153_s27 }
  0x36   : > { %s140_s17 = scalar_lea.sflag [#allocation4], %s487_s21  ;;  %s311_s2 = scalar_lea.vmem %s154_s27, 128 }
  0x37   : > { %134 = vadd.xlane.f32.xlu0 %v133_v1  ;;  %p312_p11 = scmp.ne.s32.totalorder %s154_s27, %s311_s2  ;;  %p542_p12 = scmp.ne.s32.totalorder %s536_s18, 0 }
  0x38   : > { %s378_s3 = smov [#allocation5]  }
  0x39   : > { %p313_p13 = pnand %p312_p11, %p542_p12  ;;  %s315_s4 = sshll.u32 %s378_s3, 4  ;;  %s316_s4 = int_to_ptr.vmem [resolvable:$false] %s315_s4 }
  0x3a   : > { %s317_s10 = scalar_lea.vmem %s316_s4, 256  ;;  %p318_p3 = scmp.lt.s32.totalorder %s154_s27, %s316_s4 }
  0x3b   : > { %p314_p1 = pneg %p313_p13  ;;  %p319_p5 = scmp.lt.s32.totalorder %s317_s10, %s311_s2 }
  0x3d   : > { %p320_p8 = por %p319_p5, %p318_p3 }
  0x3f   : > { %p321_p10 = pnand %p320_p8, %p314_p1 }
  0xc0   : > { %v135_v2 = vpop.xlane.xlu0 %134 }
  0xc1   : > { %281 = vrsqrt.f32 %v135_v2 }
  0xce   : > { %v282_v3 = vpop.eup %281 }
  0xcf   : > { %v137_v4 = vmul.f32 %v282_v3, %v132_v0 }
  0xd1   : > { %138 = vst [vmem:[%s131_s26] sm:$0xff] %v137_v4 }
  0xd2   : > { %324 = shalt.err (!%p321_p10)
}
  0xd3   : > { %s325_s5 = scalar_lea.hbm %s151_s30, 128  ;;  %s329_s14 = scalar_lea.hbm %s531_s1, 256 }
  0xd4   : > { %p326_p2 = scmp.ne.s32.totalorder %s151_s30, %s325_s5  ;;  %p330_p7 = scmp.lt.s32.totalorder %s151_s30, %s531_s1 }
  0xd5   : > { %p331_p0 = scmp.lt.s32.totalorder %s329_s14, %s325_s5 }
  0xd6   : > { %p327_p4 = pnand %p326_p2, %p542_p12 }
  0xd7   : > { %p332_p6 = por %p331_p0, %p330_p7 }
  0xd8   : > { %p328_p9 = pneg %p327_p4 }
  0xda   : > { %p333_p11 = pnand %p332_p6, %p328_p9 }
  0xdc   : > { %336 = shalt.err (!%p333_p11)
}
  0xdd   : > { %237 = dma.vmem_to_hbm [thread:$0]  (%p542_p12), %s154_s27, 128, %s151_s30, %s140_s17  }
  0xde PF: > { %s165_s21 = sand.u32 1, %s363_s6   ;;  %p543_p13 = scmp.ne.s32.totalorder %s537_s19, 0 }
  0xdf   : > { %p544_p1 = scmp.ge.s32.totalorder %s375_s9, 2  ;;  %s166_s22 = scalar_lea.sflag [#allocation4], %s165_s21 }
  0xe1   : > { %p244_p3 = pnand %p544_p1, %p543_p13 }
  0xe3   : > { %p245_p5 = pneg %p244_p3 }
  0xe5   : > { %358 = dma.done.wait (%p245_p5), %s166_s22, 128  }
  0xe6   : > { %360 = vsyncadd (%p245_p5), %s166_s22, 4294967168  ;;  %p14_p8 = scmp.ge.s32.totalorder %s414_s12, 4   ;;  %s545_s6 = smov %s367_s7 }
  0xe7   : > { %s546_s7 = smov %s371_s8  ;;  %s547_s8 = smov %s426_s15 }
  0xe8   : > { %s548_s9 = smov %s414_s12  ;;  %16 = sbr.rel (!%p14_p8) target bundleno = 5 (0x5), region = 69 }
  0xed   :  { %171 = vsyncpa [#allocation3], 1 }
  0xee   :  { %173 = vsyncpa [#allocation3 + $0x1], 1 }
  0xef   :  { %174 = vsyncpa [#allocation4], 1 }
  0xf0   :  { %176 = vsyncpa [#allocation4 + $0x1], 1 }

</bundles_post_ra>
